<compile_context>
chip_gen: v7x
topology: tpu7x:2x2x1
jax: 0.10.0
libtpu: 0.0.40
codegen_flags: <defaults>
</compile_context>

<pallas_src>
import functools

import jax
import jax.numpy as jnp
from jax.experimental import pallas as pl
from jax.experimental.pallas import tpu as pltpu

_NEG_LARGE = -1.0e30   # Python float (a jnp scalar here would be a captured const)


def _round_up(v, mult):
    return ((v + mult - 1) // mult) * mult


# -----------------------------------------------------------------------------
# Pass 1: s / max(||w_c||, 1e-12) -> (1, C_pad), tiled over classes.
# -----------------------------------------------------------------------------
def _w_scaled_rnorm_kernel(w_ref, rn_ref, *, s):
    w = w_ref[...].astype(jnp.float32)                      # (D, TN)
    ss = jnp.sum(w * w, axis=0, keepdims=True)              # (1, TN)
    # s / max(||w||, 1e-12) == s * rsqrt(max(ss, 1e-24))  (EUP rsqrt)
    rn_ref[...] = s * jax.lax.rsqrt(jnp.maximum(ss, 1e-24))


# -----------------------------------------------------------------------------
# Pass 2: main fused AMSoftmax kernel (streaming LSE over the class axis).
# -----------------------------------------------------------------------------
def _amsoftmax_kernel(x_ref, w_ref, wrn_ref, cb_ref, lb_ref, *refs,
                      sm, tile_n, has_col_pad, with_logits):
    if with_logits:
        logits_ref, rowloss_ref, xn_sc, m_sc, l_sc, t_sc = refs
    else:
        logits_ref = None
        rowloss_ref, xn_sc, m_sc, l_sc, t_sc = refs

    j = pl.program_id(1)                                    # class-tile index

    @pl.when(j == 0)
    def _():
        # hoisted, once per batch tile: normalize x rows in f32, cast once
        x = x_ref[...].astype(jnp.float32)                  # (TM, D)
        x_rn = jax.lax.rsqrt(
            jnp.maximum(jnp.sum(x * x, axis=1, keepdims=True), 1e-24))
        xn_sc[...] = (x * x_rn).astype(xn_sc.dtype)
        m_sc[...] = jnp.full_like(m_sc, _NEG_LARGE)
        l_sc[...] = jnp.zeros_like(l_sc)
        t_sc[...] = jnp.zeros_like(t_sc)

    # MXU matmul on the pre-normalized rows (f32 accumulation).
    xw = jnp.dot(xn_sc[...], w_ref[...],
                 preferred_element_type=jnp.float32)        # (TM, TN)
    cos_s = xw * wrn_ref[...]                               # s * cosine

    tm = cos_s.shape[0]
    local_col = jax.lax.broadcasted_iota(jnp.int32, (tm, tile_n), 1)
    is_label = local_col == (lb_ref[...] - j * tile_n)      # (TM, TN) bool

    logits = jnp.where(is_label, cos_s - sm, cos_s)         # s*(cos - m*onehot)
    if has_col_pad:
        logits = logits + cb_ref[...]    # 0 on real classes, -1e30 on padding
    if with_logits:
        logits_ref[...] = logits.astype(logits_ref.dtype)   # streaming writeback

    # online log-sum-exp over the class axis
    m_new = jnp.maximum(m_sc[...], jnp.max(logits, axis=1, keepdims=True))
    alpha = jnp.exp(m_sc[...] - m_new)
    p = jnp.exp(logits - m_new)
    l_sc[...] = alpha * l_sc[...] + jnp.sum(p, axis=1, keepdims=True)
    m_sc[...] = m_new
    t_sc[...] = t_sc[...] + jnp.sum(jnp.where(is_label, logits, 0.0),
                                    axis=1, keepdims=True)

    @pl.when(j == pl.num_programs(1) - 1)
    def _():
        # per-row cross-entropy contribution: logsumexp - target_logit
        rowloss_ref[...] = (m_sc[...] + jnp.log(l_sc[...])) - t_sc[...]


def amsoftmax_forward(x, W, lb, m=0.35, s=30.0, *,
                      compute_dtype=jnp.float32,   # use bfloat16 for max MXU/HBM perf
                      logits_dtype=jnp.float32,
                      return_logits=True,
                      tile_m=None, tile_n=None):
    """Returns (loss, costh_m_s) exactly like AMSoftmax.forward.

    If return_logits=False, returns (loss, None) and skips the (B, C) logits
    HBM writeback entirely (the dominant HBM stream for large C).
    """
    B, D = x.shape
    D2, C = W.shape
    assert D == D2 and lb.shape[0] == B

    # MXU / lane-friendly tiles: TM multiple of 8, TN multiple of 128.
    if tile_m is None:
        tile_m = min(512, _round_up(B, 8))
        # prefer >= 2 batch tiles so the "parallel" axis can shard across
        # both v7x TensorCores
        if B > 8 and _round_up(B, tile_m) // tile_m < 2:
            tile_m = _round_up((B + 1) // 2, 8)
    if tile_n is None:
        tile_n = min(512, _round_up(C, 128))
    B_pad = _round_up(B, tile_m)
    C_pad = _round_up(C, tile_n)
    nm, nn = B_pad // tile_m, C_pad // tile_n
    has_col_pad = C_pad != C

    x_p = x if B_pad == B else jnp.pad(x, ((0, B_pad - B), (0, 0)))
    W_p = W if C_pad == C else jnp.pad(W, ((0, 0), (0, C_pad - C)))
    lb_p = jnp.full((B_pad, 1), -1, dtype=jnp.int32)        # -1 never matches
    lb_p = lb_p.at[:B, 0].set(lb.astype(jnp.int32))

    # ---- pass 1: scaled W column reciprocal norms (hoisted out of batch loop)
    # TODO(synk): for very large D, tile pass 1 over D (accumulate sum-of-squares)
    # so a (D, tile_n) block stays inside v7x's 64 MiB VMEM.
    wrn_s = pl.pallas_call(
        functools.partial(_w_scaled_rnorm_kernel, s=float(s)),
        grid=(nn,),
        in_specs=[pl.BlockSpec((D, tile_n), lambda j: (0, j))],
        out_specs=pl.BlockSpec((1, tile_n), lambda j: (0, j)),
        out_shape=jax.ShapeDtypeStruct((1, C_pad), jnp.float32),
        compiler_params=pltpu.CompilerParams(
            dimension_semantics=("parallel",)),
    )(W_p)

    # additive column bias row: 0 for real classes, -1e30 for padded classes
    cbias = jnp.zeros((1, C_pad), jnp.float32)
    if has_col_pad:
        cbias = cbias.at[0, C:].set(_NEG_LARGE)

    # W stored in HBM in the MXU operand dtype (bf16 halves the W stream)
    W_c = W_p.astype(compute_dtype)

    # rough per-step VMEM need (double-buffered in/out tiles + scratch)
    csize = jnp.dtype(compute_dtype).itemsize
    lsize = jnp.dtype(logits_dtype).itemsize
    est = (2 * (tile_m * D * x.dtype.itemsize + D * tile_n * csize
                + 2 * tile_n * 4 + tile_m * 4)
           + 2 * tile_m * 4
           + (2 * tile_m * tile_n * lsize if return_logits else 0)
           + tile_m * D * csize
           + 3 * tile_m * 128 * 4)                # (TM,1) scratch lane-padded
    vmem_bytes = int(min(40 * 1024 * 1024, max(32 * 1024 * 1024, 2 * est)))

    kernel = functools.partial(
        _amsoftmax_kernel, sm=float(s) * float(m), tile_n=tile_n,
        has_col_pad=has_col_pad, with_logits=return_logits)

    out_specs = [pl.BlockSpec((tile_m, 1), lambda i, j: (i, 0))]       # rowloss
    out_shape = [jax.ShapeDtypeStruct((B_pad, 1), jnp.float32)]
    if return_logits:
        out_specs.insert(0, pl.BlockSpec((tile_m, tile_n), lambda i, j: (i, j)))
        out_shape.insert(0, jax.ShapeDtypeStruct((B_pad, C_pad), logits_dtype))

    outs = pl.pallas_call(
        kernel,
        grid=(nm, nn),
        in_specs=[
            pl.BlockSpec((tile_m, D), lambda i, j: (i, 0)),       # x
            pl.BlockSpec((D, tile_n), lambda i, j: (0, j)),       # W (compute dtype)
            pl.BlockSpec((1, tile_n), lambda i, j: (0, j)),       # s/||w_c||
            pl.BlockSpec((1, tile_n), lambda i, j: (0, j)),       # padded-col bias
            pl.BlockSpec((tile_m, 1), lambda i, j: (i, 0)),       # labels
        ],
        out_specs=out_specs,
        out_shape=out_shape,
        scratch_shapes=[
            pltpu.VMEM((tile_m, D), compute_dtype),   # normalized x rows
            pltpu.VMEM((tile_m, 1), jnp.float32),     # running max
            pltpu.VMEM((tile_m, 1), jnp.float32),     # running sum-exp
            pltpu.VMEM((tile_m, 1), jnp.float32),     # target logit
        ],
        compiler_params=pltpu.CompilerParams(
            dimension_semantics=("parallel", "arbitrary"),
            vmem_limit_bytes=vmem_bytes),
    )(x_p, W_c, wrn_s, cbias, lb_p)

    if return_logits:
        logits_pad, rowloss = outs
        logits = logits_pad[:B, :C]
    else:
        (rowloss,) = outs
        logits = None
    loss = jnp.mean(rowloss[:B, 0])     # CrossEntropyLoss default 'mean'
    return loss, logits


# -----------------------------------------------------------------------------
# plain-JAX reference (mirrors the PyTorch module)
# -----------------------------------------------------------------------------
def _reference(x, W, lb, m=0.35, s=30.0):
    xn = x / jnp.maximum(jnp.linalg.norm(x, axis=1, keepdims=True), 1e-12)
    wn = W / jnp.maximum(jnp.linalg.norm(W, axis=0, keepdims=True), 1e-12)
    costh = xn @ wn
    logits = s * (costh - m * jax.nn.one_hot(lb, W.shape[1], dtype=jnp.float32))
    loss = jnp.mean(
        jax.scipy.special.logsumexp(logits, axis=1)
        - jnp.take_along_axis(logits, lb[:, None], axis=1)[:, 0])
    return loss, logits


if __name__ == "__main__":
    key = jax.random.PRNGKey(0)

    # ---- case 1: shapes implied by the module defaults (small) -------------
    B, in_feats, n_classes = 8, 32, 10
    k_x, k_w, k_lb, key = jax.random.split(key, 4)
    x = jax.random.normal(k_x, (B, in_feats), dtype=jnp.float32)
    xavier_std = (2.0 / (in_feats + n_classes)) ** 0.5   # xavier_normal_, gain=1
    W = jax.random.normal(k_w, (in_feats, n_classes), dtype=jnp.float32) * xavier_std
    lb = jax.random.randint(k_lb, (B,), 0, n_classes, dtype=jnp.int32)

    loss, logits = amsoftmax_forward(x, W, lb, m=0.35, s=30.0)
    jax.block_until_ready((loss, logits))
    ref_loss, ref_logits = _reference(x, W, lb)
    assert jnp.allclose(logits, ref_logits, atol=1e-3, rtol=1e-3)
    assert jnp.allclose(loss, ref_loss, atol=1e-3, rtol=1e-3)

    # ---- case 2: multi-tile grid (padded batch rows + padded class cols) ---
    B2, D2, C2 = 13, 40, 300
    k_x, k_w, k_lb, key = jax.random.split(key, 4)
    x2 = jax.random.normal(k_x, (B2, D2), dtype=jnp.float32)
    W2 = jax.random.normal(k_w, (D2, C2), dtype=jnp.float32) * (2.0 / (D2 + C2)) ** 0.5
    lb2 = jax.random.randint(k_lb, (B2,), 0, C2, dtype=jnp.int32)

    loss2, logits2 = amsoftmax_forward(x2, W2, lb2, tile_m=8, tile_n=128)
    jax.block_until_ready((loss2, logits2))
    ref_loss2, ref_logits2 = _reference(x2, W2, lb2)
    assert jnp.allclose(logits2, ref_logits2, atol=1e-3, rtol=1e-3)
    assert jnp.allclose(loss2, ref_loss2, atol=1e-3, rtol=1e-3)

    # ---- case 3: bf16 MXU operands (f32 accumulation), loose tolerance -----
    loss3, logits3 = amsoftmax_forward(x2, W2, lb2, tile_m=8, tile_n=128,
                                       compute_dtype=jnp.bfloat16)
    jax.block_until_ready((loss3, logits3))
    assert jnp.allclose(logits3, ref_logits2, atol=0.5, rtol=0.05)
    assert jnp.allclose(loss3, ref_loss2, atol=0.5, rtol=0.05)

    # ---- case 4: loss-only mode (skips the (B, C) logits HBM writeback) ----
    loss4, logits4 = amsoftmax_forward(x2, W2, lb2, tile_m=8, tile_n=128,
                                       compute_dtype=jnp.bfloat16,
                                       return_logits=False)
    jax.block_until_ready(loss4)
    assert logits4 is None
    assert jnp.allclose(loss4, ref_loss2, atol=0.5, rtol=0.05)

    print("KERNEL_OK")
</pallas_src>

<mosaic_0001>
module attributes {stable_mosaic.version = 11 : i64} {
  func.func @_w_scaled_rnorm_kernel(%arg0: i32, %arg1: memref<32x128xf32, #tpu.memory_space<vmem>>, %arg2: memref<1x128xf32, #tpu.memory_space<vmem>>) attributes {dimension_semantics = [#tpu.dimension_semantics<parallel>], iteration_bounds = array<i64: 1>, scalar_prefetch = 0 : i64, scratch_operands = 0 : i64, tpu.core_type = #tpu.core_type<tc>, window_params = [{transform_indices = @transform_0, window_bounds = array<i64: 32, 128>}, {transform_indices = @transform_1, window_bounds = array<i64: 1, 128>}]} {
    %c0 = arith.constant 0 : index
    %c0_0 = arith.constant 0 : index
    %0 = vector.load %arg1[%c0, %c0_0] : memref<32x128xf32, #tpu.memory_space<vmem>>, vector<32x128xf32>
    %1 = arith.mulf %0, %0 : vector<32x128xf32>
    %cst = arith.constant dense<0.000000e+00> : vector<128xf32>
    %2 = vector.multi_reduction <add>, %1, %cst [0] : vector<32x128xf32> to vector<128xf32>
    %3 = vector.shape_cast %2 : vector<128xf32> to vector<1x128xf32>
    %cst_1 = arith.constant 1.000000e-24 : f32
    %4 = vector.broadcast %cst_1 : f32 to vector<1x128xf32>
    %5 = arith.maximumf %3, %4 : vector<1x128xf32>
    %6 = math.rsqrt %5 : vector<1x128xf32>
    %cst_2 = arith.constant 3.000000e+01 : f32
    %7 = vector.broadcast %cst_2 : f32 to vector<1x128xf32>
    %8 = arith.mulf %7, %6 : vector<1x128xf32>
    %c0_3 = arith.constant 0 : index
    %c0_4 = arith.constant 0 : index
    %9 = vector.load %arg2[%c0_3, %c0_4] : memref<1x128xf32, #tpu.memory_space<vmem>>, vector<1x128xf32>
    tpu.vector_store %arg2[%c0_3, %c0_4], %8 {strides = array<i32>} : memref<1x128xf32, #tpu.memory_space<vmem>>, vector<1x128xf32>,
    return
  }
  func.func @transform_0(%arg0: i32) -> (i32, i32) {
    %c0_i32 = arith.constant 0 : i32
    %c0_i32_0 = arith.constant 0 : i32
    return %c0_i32, %arg0 : i32, i32
  }
  func.func @transform_1(%arg0: i32) -> (i32, i32) {
    %c0_i32 = arith.constant 0 : i32
    %c0_i32_0 = arith.constant 0 : i32
    return %c0_i32, %arg0 : i32, i32
  }
}

</mosaic_0001>

<bundles_post_ra>
// kernel: tpu_custom_call.1
= control target key start
LH: loop header
LB: loop body
LE: loop exit
PB: predicated region body
PF: predicated region fallthrough
CT: control target
= control target key end

     0   :  { %6 = vsyncpa [#allocation3], 0  ;;  %s151_s0 = inlined_call_operand.hbm [shape: f32[32,128], index: 0, kind: input, shape index: {}]   ;;  %s152_s1 = inlined_call_operand.hbm [shape: f32[1,128], index: 1, kind: output, shape index: {}]  }
   0x1   :  { %7 = vsyncpa [#allocation4], 0  ;;  %s113_s6 = smov [#allocation2]   ;;  %s65_s10 = scalar_lea.hbm %s151_s0, 512 }
   0x2   :  { %s13_s7 = sshll.u32 %s113_s6, 4  ;;  %p66_p0 = scmp.ne.s32.totalorder %s151_s0, %s65_s10  ;;  %s14_s7 = int_to_ptr.vmem [resolvable:$true] %s13_s7 }
   0x3   :  { %p69_p1 = scmp.lt.u32.totalorder %s65_s10, %s151_s0 }
   0x5   :  { %p71_p2 = pnand %p69_p1, %p66_p0 }
   0x7   :  { %74 = shalt.err (!%p71_p2)
}
   0x8   :  { %s75_s15 = scalar_lea.vmem %s14_s7, 512  ;;  %p80_p4 = scmp.lt.s32.totalorder %s14_s7, %s14_s7 }
   0x9   :  { %p76_p3 = scmp.ne.s32.totalorder %s14_s7, %s75_s15  ;;  %p81_p5 = scmp.lt.s32.totalorder %s75_s15, %s75_s15 }
   0xb   :  { %p82_p6 = por %p81_p5, %p80_p4 }
   0xd   :  { %p83_p7 = pnand %p82_p6, %p76_p3 }
   0xf   :  { %86 = shalt.err (!%p83_p7)
}
  0x10   :  { %s114_s16 = smov 128   ;;  %s115_s17 = smov 8  }
  0x11   :  { %19 = dma.hbm_to_vmem [thread:$0]  %s151_s0, 512, %s14_s7, [#allocation3], %s114_s16, %s114_s16, %s115_s17  }
  0x12   :  { %109 = dma.done.wait [#allocation3], 512  }
  0x13   :  { %110 = vsyncadd [#allocation3], 4294966784  ;;  %v23_v0 = vld [vmem:[#allocation2] sm:$0xff]  ;;  %v24_v1 = vld [vmem:[#allocation2 + $0x8] sm:$0xff]  ;;  %s116_s0 = smov [#allocation5]  }
  0x14   :  { %v25_v2 = vld [vmem:[#allocation2 + $0x10] sm:$0xff]  ;;  %v26_v3 = vld [vmem:[#allocation2 + $0x18] sm:$0xff]  ;;  %v27_v4 = vmul.f32 %v23_v0, %v23_v0  ;;  %v28_v5 = vmul.f32 %v24_v1, %v24_v1  ;;  %s50_s20 = sshll.u32 %s116_s0, 4  ;;  %s51_s20 = int_to_ptr.vmem [resolvable:$true] %s50_s20 }
  0x15   :  { %v29_v6 = vmul.f32 %v25_v2, %v25_v2  ;;  %v30_v7 = vmul.f32 %v26_v3, %v26_v3  ;;  %s87_s21 = scalar_lea.vmem %s51_s20, 16  ;;  %s91_s22 = scalar_lea.vmem %s51_s20, 32 }
  0x16   :  { %v31_v8 = vadd.f32 %v28_v5, %v27_v4  ;;  %p88_p8 = scmp.ne.s32.totalorder %s51_s20, %s87_s21  ;;  %p92_p9 = scmp.lt.s32.totalorder %s51_s20, %s51_s20 }
  0x17   :  { %p93_p10 = scmp.lt.s32.totalorder %s91_s22, %s87_s21 }
  0x18   :  { %v32_v9 = vadd.f32 %v31_v8, %v29_v6 }
  0x19   :  { %p94_p11 = por %p93_p10, %p92_p9 }
  0x1a   :  { %v33_v10 = vadd.f32 %v32_v9, %v30_v7 }
  0x1b   :  { %p95_p12 = pnand %p94_p11, %p88_p8 }
  0x1c   :  { %v34_v11 = vrot.slane %v33_v10, 4 }
  0x1e   :  { %v35_v12 = vadd.f32 %v34_v11, %v33_v10 }
  0x20   :  { %v36_v13 = vrot.slane %v35_v12, 2 }
  0x22   :  { %v37_v14 = vadd.f32 %v36_v13, %v35_v12 }
  0x24   :  { %v38_v15 = vrot.slane %v37_v14, 1 }
  0x26   :  { %v39_v16 = vadd.f32 %v38_v15, %v37_v14 }
  0x28   :  { %v40_v17 = vmax.f32 %v39_v16, 1e-24 }
  0x2a   :  { %63 = vrsqrt.f32 %v40_v17 }
  0x34   :  { %v64_v18 = vpop.eup %63 }
  0x35   :  { %v42_v19 = vmul.f32 30.0, %v64_v18 }
  0x37   :  { %43 = vst [vmem:[#allocation5] sm:$0x1] %v42_v19 }
  0x38   :  { %98 = shalt.err (!%p95_p12)
}
  0x39   :  { %s99_s25 = scalar_lea.hbm %s152_s1, 16 }
  0x3a   :  { %p100_p13 = scmp.ne.s32.totalorder %s152_s1, %s99_s25  ;;  %p103_p0 = scmp.lt.u32.totalorder %s99_s25, %s152_s1 }
  0x3c   :  { %p105_p1 = pnand %p103_p0, %p100_p13 }
  0x3e   :  { %108 = shalt.err (!%p105_p1)
}
  0x3f   :  { %53 = dma.vmem_to_hbm [thread:$0]  %s51_s20, 16, %s152_s1, [#allocation4]  }
  0x40   :  { %111 = dma.done.wait [#allocation4], 16  }
  0x41   :  { %112 = vsyncadd [#allocation4], 4294967280 }
  0x42   :  { %57 = vsyncpa [#allocation3], 1 }
  0x43   :  { %58 = vsyncpa [#allocation4], 1 }

</bundles_post_ra>
